<compile_context>
chip_gen: v5e
topology: v5e:2x2
jax: 0.10.0
libtpu: 0.0.40
codegen_flags: <defaults>
</compile_context>

<pallas_src>
import jax
import jax.numpy as jnp
from jax.experimental import pallas as pl
from jax.experimental.pallas import tpu as pltpu

IN_CH = 4
HID_CH = 32
TOT_CH = IN_CH + HID_CH          # 36
FLAT = TOT_CH * IN_CH            # 144  (lane-dense flattened output row)
DEFAULT_BATCH_TILE = 512         # fits VMEM comfortably on v5e/v6e/v7x


def _round_up(x, m):
    return ((x + m - 1) // m) * m


def _converter_kernel(z_ref, wru_x_ref, wru_h_ref, wnx_ref, wnh_ref,
                      bru_ref, bnx_ref, bnh_ref, scat_ref, prefix_ref, out_ref):
    # z_ref      : (TB, TOT_CH)
    # wru_x_ref  : (IN_CH, 2*HID_CH)   pre-transposed [r|u] input weights
    # wru_h_ref  : (HID_CH, 2*HID_CH)  pre-transposed [r|u] hidden weights
    # wnx_ref    : (IN_CH, HID_CH)     pre-transposed n-gate input weights
    # wnh_ref    : (HID_CH, HID_CH)    pre-transposed n-gate hidden weights
    # bru_ref    : (1, 2*HID_CH)       b_ih[:2H] + b_hh[:2H]
    # bnx_ref    : (1, HID_CH)         b_ih[2H:]
    # bnh_ref    : (1, HID_CH)         b_hh[2H:]
    # scat_ref   : (HID_CH, FLAT)      constant: hidden j -> flat lane 16 + 4*j
    # prefix_ref : (1, FLAT)           constant: flattened out_base (identity prefix)
    # out_ref    : (TB, FLAT)
    z = z_ref[...]                                    # (TB, TOT_CH)
    x = z[:, :IN_CH]                                  # (TB, IN_CH)
    h = jnp.clip(z[:, IN_CH:], -1.0, 1.0)             # (TB, HID_CH)  clamp(-1, 1)

    # Fused r/u gates (torch GRUCell gate order: r, z(=u), n).
    g_ru = (jnp.dot(x, wru_x_ref[...], preferred_element_type=jnp.float32)
            + jnp.dot(h, wru_h_ref[...], preferred_element_type=jnp.float32)
            + bru_ref[...])                           # (TB, 2*HID_CH)
    r = jax.nn.sigmoid(g_ru[:, :HID_CH])
    u = jax.nn.sigmoid(g_ru[:, HID_CH:])

    i_n = jnp.dot(x, wnx_ref[...], preferred_element_type=jnp.float32) + bnx_ref[...]
    h_n = jnp.dot(h, wnh_ref[...], preferred_element_type=jnp.float32) + bnh_ref[...]
    n = jnp.tanh(i_n + r * h_n)
    model_out = (1.0 - u) * n + u * h                 # (TB, HID_CH)

    # Lane-dense flat output row:
    #   out_flat[b, 4*row + col] = out[b, row, col]
    # = identity prefix (rows < IN_CH) + model_out scattered into (row >= IN_CH, col 0).
    out_flat = (jnp.dot(model_out, scat_ref[...], preferred_element_type=jnp.float32)
                + prefix_ref[...])                    # (TB, FLAT)
    out_ref[...] = out_flat.astype(out_ref.dtype)


def continuous_rnn_converter(z, w_ih, w_hh, b_ih, b_hh, *, batch_tile=DEFAULT_BATCH_TILE):
    """z: (B, IN_CH + HID_CH) float32 -> (B, IN_CH + HID_CH, IN_CH) float32."""
    B, C = z.shape
    assert C == TOT_CH

    # Batch tile: large for throughput, shrunk (sublane-aligned) for small B.
    tile = min(batch_tile, _round_up(B, 8))
    b_pad = pl.cdiv(B, tile) * tile
    if b_pad != B:
        z = jnp.pad(z, ((0, b_pad - B), (0, 0)))

    # Weight prep (torch GRUCell shapes: w_ih (3H, in), w_hh (3H, H), biases (3H,)).
    wih_t = w_ih.T                                    # (IN_CH, 3H)
    whh_t = w_hh.T                                    # (HID_CH, 3H)
    two_h = 2 * HID_CH
    wru_x = wih_t[:, :two_h]                          # (IN_CH, 2H)
    wru_h = whh_t[:, :two_h]                          # (HID_CH, 2H)
    wnx = wih_t[:, two_h:]                            # (IN_CH, H)
    wnh = whh_t[:, two_h:]                            # (HID_CH, H)
    bru = (b_ih[:two_h] + b_hh[:two_h]).reshape(1, two_h)
    bnx = b_ih[two_h:].reshape(1, HID_CH)
    bnh = b_hh[two_h:].reshape(1, HID_CH)

    # Constant scatter matrix: hidden channel j -> flat lane IN_CH*IN_CH + j*IN_CH.
    scat = jnp.zeros((HID_CH, FLAT), jnp.float32)
    scat = scat.at[jnp.arange(HID_CH),
                   IN_CH * IN_CH + jnp.arange(HID_CH) * IN_CH].set(1.0)
    # Constant identity-prefix row = flattened out_base.
    out_base = jnp.zeros((TOT_CH, IN_CH), jnp.float32)
    out_base = out_base.at[:IN_CH, :IN_CH].set(jnp.eye(IN_CH, dtype=jnp.float32))
    prefix = out_base.reshape(1, FLAT)

    grid = (b_pad // tile,)
    out_flat = pl.pallas_call(
        _converter_kernel,
        out_shape=jax.ShapeDtypeStruct((b_pad, FLAT), jnp.float32),
        grid_spec=pltpu.PrefetchScalarGridSpec(
            num_scalar_prefetch=0,
            grid=grid,
            in_specs=[
                pl.BlockSpec((tile, TOT_CH), lambda i: (i, 0)),          # z
                pl.BlockSpec((IN_CH, two_h), lambda i: (0, 0)),          # W_ru (x part)
                pl.BlockSpec((HID_CH, two_h), lambda i: (0, 0)),         # W_ru (h part)
                pl.BlockSpec((IN_CH, HID_CH), lambda i: (0, 0)),         # W_n  (x part)
                pl.BlockSpec((HID_CH, HID_CH), lambda i: (0, 0)),        # W_n  (h part)
                pl.BlockSpec((1, two_h), lambda i: (0, 0)),              # b_ru
                pl.BlockSpec((1, HID_CH), lambda i: (0, 0)),             # b_nx
                pl.BlockSpec((1, HID_CH), lambda i: (0, 0)),             # b_nh
                pl.BlockSpec((HID_CH, FLAT), lambda i: (0, 0)),          # scatter matrix
                pl.BlockSpec((1, FLAT), lambda i: (0, 0)),               # identity prefix
            ],
            out_specs=pl.BlockSpec((tile, FLAT), lambda i: (i, 0)),      # lane-dense out
        ),
        compiler_params=pltpu.CompilerParams(dimension_semantics=("parallel",)),
    )(z, wru_x, wru_h, wnx, wnh, bru, bnx, bnh, scat, prefix)

    return out_flat[:B].reshape(B, TOT_CH, IN_CH)


def _reference(z, w_ih, w_hh, b_ih, b_hh):
    """Pure-JAX reference mirroring the PyTorch forward (GRUCell model)."""
    x = z[:, :IN_CH]
    h = jnp.clip(z[:, IN_CH:], -1.0, 1.0)
    gi = x @ w_ih.T + b_ih
    gh = h @ w_hh.T + b_hh
    i_r, i_u, i_n = jnp.split(gi, 3, axis=-1)
    h_r, h_u, h_n = jnp.split(gh, 3, axis=-1)
    r = jax.nn.sigmoid(i_r + h_r)
    u = jax.nn.sigmoid(i_u + h_u)
    n = jnp.tanh(i_n + r * h_n)
    model_out = (1.0 - u) * n + u * h
    out_base = jnp.zeros((TOT_CH, IN_CH), jnp.float32)
    out_base = out_base.at[:IN_CH, :IN_CH].set(jnp.eye(IN_CH, dtype=jnp.float32))
    out = jnp.broadcast_to(out_base, (z.shape[0], TOT_CH, IN_CH))
    out = out.at[:, IN_CH:, 0].set(model_out)
    return out


if __name__ == "__main__":
    key = jax.random.PRNGKey(0)
    k_z, k_wih, k_whh, k_bih, k_bhh = jax.random.split(key, 5)

    B = 10                     # small, non-multiple-of-8: exercises cdiv + padding path
    z = jax.random.normal(k_z, (B, TOT_CH), jnp.float32)

    # Deterministic synthetic GRUCell parameters (torch shapes: (3H, in)/(3H, H)/(3H,)).
    scale = 1.0 / jnp.sqrt(jnp.float32(HID_CH))
    w_ih = jax.random.uniform(k_wih, (3 * HID_CH, IN_CH), jnp.float32, -scale, scale)
    w_hh = jax.random.uniform(k_whh, (3 * HID_CH, HID_CH), jnp.float32, -scale, scale)
    b_ih = jax.random.uniform(k_bih, (3 * HID_CH,), jnp.float32, -scale, scale)
    b_hh = jax.random.uniform(k_bhh, (3 * HID_CH,), jnp.float32, -scale, scale)

    out = continuous_rnn_converter(z, w_ih, w_hh, b_ih, b_hh)
    out = jax.block_until_ready(out)

    ref = _reference(z, w_ih, w_hh, b_ih, b_hh)
    assert out.shape == (B, TOT_CH, IN_CH)
    assert jnp.allclose(out, ref, atol=1e-5, rtol=1e-5), "mismatch vs reference"

    print("KERNEL_OK")
</pallas_src>

<mosaic_0001>
module attributes {stable_mosaic.version = 11 : i64} {
  func.func @_converter_kernel(%arg0: i32, %arg1: memref<16x36xf32, #tpu.memory_space<vmem>>, %arg2: memref<4x64xf32, #tpu.memory_space<vmem>>, %arg3: memref<32x64xf32, #tpu.memory_space<vmem>>, %arg4: memref<4x32xf32, #tpu.memory_space<vmem>>, %arg5: memref<32x32xf32, #tpu.memory_space<vmem>>, %arg6: memref<1x64xf32, #tpu.memory_space<vmem>>, %arg7: memref<1x32xf32, #tpu.memory_space<vmem>>, %arg8: memref<1x32xf32, #tpu.memory_space<vmem>>, %arg9: memref<32x144xf32, #tpu.memory_space<vmem>>, %arg10: memref<1x144xf32, #tpu.memory_space<vmem>>, %arg11: memref<16x144xf32, #tpu.memory_space<vmem>>) attributes {dimension_semantics = [#tpu.dimension_semantics<parallel>], iteration_bounds = array<i64: 1>, scalar_prefetch = 0 : i64, scratch_operands = 0 : i64, tpu.core_type = #tpu.core_type<tc>, window_params = [{transform_indices = @transform_0, window_bounds = array<i64: 16, 36>}, {pipeline_mode = #tpu.pipeline_mode<synchronous>, transform_indices = @transform_1, window_bounds = array<i64: 4, 64>}, {pipeline_mode = #tpu.pipeline_mode<synchronous>, transform_indices = @transform_2, window_bounds = array<i64: 32, 64>}, {pipeline_mode = #tpu.pipeline_mode<synchronous>, transform_indices = @transform_3, window_bounds = array<i64: 4, 32>}, {pipeline_mode = #tpu.pipeline_mode<synchronous>, transform_indices = @transform_4, window_bounds = array<i64: 32, 32>}, {pipeline_mode = #tpu.pipeline_mode<synchronous>, transform_indices = @transform_5, window_bounds = array<i64: 1, 64>}, {pipeline_mode = #tpu.pipeline_mode<synchronous>, transform_indices = @transform_6, window_bounds = array<i64: 1, 32>}, {pipeline_mode = #tpu.pipeline_mode<synchronous>, transform_indices = @transform_7, window_bounds = array<i64: 1, 32>}, {pipeline_mode = #tpu.pipeline_mode<synchronous>, transform_indices = @transform_8, window_bounds = array<i64: 32, 144>}, {pipeline_mode = #tpu.pipeline_mode<synchronous>, transform_indices = @transform_9, window_bounds = array<i64: 1, 144>}, {transform_indices = @transform_10, window_bounds = array<i64: 16, 144>}]} {
    %c0 = arith.constant 0 : index
    %c0_0 = arith.constant 0 : index
    %0 = vector.load %arg1[%c0, %c0_0] : memref<16x36xf32, #tpu.memory_space<vmem>>, vector<16x36xf32>
    %1 = vector.extract_strided_slice %0 {offsets = [0, 0], sizes = [16, 4], strides = [1, 1]} : vector<16x36xf32> to vector<16x4xf32>
    %2 = vector.extract_strided_slice %0 {offsets = [0, 4], sizes = [16, 32], strides = [1, 1]} : vector<16x36xf32> to vector<16x32xf32>
    %cst = arith.constant -1.000000e+00 : f32
    %cst_1 = arith.constant 1.000000e+00 : f32
    %3 = vector.broadcast %cst : f32 to vector<16x32xf32>
    %4 = arith.maximumf %3, %2 : vector<16x32xf32>
    %5 = vector.broadcast %cst_1 : f32 to vector<16x32xf32>
    %6 = arith.minimumf %5, %4 : vector<16x32xf32>
    %c0_2 = arith.constant 0 : index
    %c0_3 = arith.constant 0 : index
    %7 = vector.load %arg2[%c0_2, %c0_3] : memref<4x64xf32, #tpu.memory_space<vmem>>, vector<4x64xf32>
    %cst_4 = arith.constant dense<0.000000e+00> : vector<16x64xf32>
    %8 = tpu.matmul %1, %7, %cst_4 {dimension_numbers = #tpu.dot_dimension_numbers<[1], [0], [0], [1], [0, 0, 1, 1], [], []>} : vector<16x4xf32>, vector<4x64xf32>, vector<16x64xf32> -> vector<16x64xf32>
    %c0_5 = arith.constant 0 : index
    %c0_6 = arith.constant 0 : index
    %9 = vector.load %arg3[%c0_5, %c0_6] : memref<32x64xf32, #tpu.memory_space<vmem>>, vector<32x64xf32>
    %cst_7 = arith.constant dense<0.000000e+00> : vector<16x64xf32>
    %10 = tpu.matmul %6, %9, %cst_7 {dimension_numbers = #tpu.dot_dimension_numbers<[1], [0], [0], [1], [0, 0, 1, 1], [], []>} : vector<16x32xf32>, vector<32x64xf32>, vector<16x64xf32> -> vector<16x64xf32>
    %11 = arith.addf %8, %10 : vector<16x64xf32>
    %c0_8 = arith.constant 0 : index
    %c0_9 = arith.constant 0 : index
    %12 = vector.load %arg6[%c0_8, %c0_9] : memref<1x64xf32, #tpu.memory_space<vmem>>, vector<1x64xf32>
    %13 = vector.broadcast %12 : vector<1x64xf32> to vector<16x64xf32>
    %14 = arith.addf %11, %13 : vector<16x64xf32>
    %15 = vector.extract_strided_slice %14 {offsets = [0, 0], sizes = [16, 32], strides = [1, 1]} : vector<16x64xf32> to vector<16x32xf32>
    %16 = arith.negf %15 : vector<16x32xf32>
    %17 = math.exp %16 : vector<16x32xf32>
    %cst_10 = arith.constant 1.000000e+00 : f32
    %18 = vector.broadcast %cst_10 : f32 to vector<16x32xf32>
    %19 = arith.addf %18, %17 : vector<16x32xf32>
    %20 = arith.divf %18, %19 : vector<16x32xf32>
    %21 = vector.extract_strided_slice %14 {offsets = [0, 32], sizes = [16, 32], strides = [1, 1]} : vector<16x64xf32> to vector<16x32xf32>
    %22 = arith.negf %21 : vector<16x32xf32>
    %23 = math.exp %22 : vector<16x32xf32>
    %cst_11 = arith.constant 1.000000e+00 : f32
    %24 = vector.broadcast %cst_11 : f32 to vector<16x32xf32>
    %25 = arith.addf %24, %23 : vector<16x32xf32>
    %26 = arith.divf %24, %25 : vector<16x32xf32>
    %c0_12 = arith.constant 0 : index
    %c0_13 = arith.constant 0 : index
    %27 = vector.load %arg4[%c0_12, %c0_13] : memref<4x32xf32, #tpu.memory_space<vmem>>, vector<4x32xf32>
    %cst_14 = arith.constant dense<0.000000e+00> : vector<16x32xf32>
    %28 = tpu.matmul %1, %27, %cst_14 {dimension_numbers = #tpu.dot_dimension_numbers<[1], [0], [0], [1], [0, 0, 1, 1], [], []>} : vector<16x4xf32>, vector<4x32xf32>, vector<16x32xf32> -> vector<16x32xf32>
    %c0_15 = arith.constant 0 : index
    %c0_16 = arith.constant 0 : index
    %29 = vector.load %arg7[%c0_15, %c0_16] : memref<1x32xf32, #tpu.memory_space<vmem>>, vector<1x32xf32>
    %30 = vector.broadcast %29 : vector<1x32xf32> to vector<16x32xf32>
    %31 = arith.addf %28, %30 : vector<16x32xf32>
    %c0_17 = arith.constant 0 : index
    %c0_18 = arith.constant 0 : index
    %32 = vector.load %arg5[%c0_17, %c0_18] : memref<32x32xf32, #tpu.memory_space<vmem>>, vector<32x32xf32>
    %cst_19 = arith.constant dense<0.000000e+00> : vector<16x32xf32>
    %33 = tpu.matmul %6, %32, %cst_19 {dimension_numbers = #tpu.dot_dimension_numbers<[1], [0], [0], [1], [0, 0, 1, 1], [], []>} : vector<16x32xf32>, vector<32x32xf32>, vector<16x32xf32> -> vector<16x32xf32>
    %c0_20 = arith.constant 0 : index
    %c0_21 = arith.constant 0 : index
    %34 = vector.load %arg8[%c0_20, %c0_21] : memref<1x32xf32, #tpu.memory_space<vmem>>, vector<1x32xf32>
    %35 = vector.broadcast %34 : vector<1x32xf32> to vector<16x32xf32>
    %36 = arith.addf %33, %35 : vector<16x32xf32>
    %37 = arith.mulf %20, %36 : vector<16x32xf32>
    %38 = arith.addf %31, %37 : vector<16x32xf32>
    %39 = math.tanh %38 : vector<16x32xf32>
    %cst_22 = arith.constant 1.000000e+00 : f32
    %40 = vector.broadcast %cst_22 : f32 to vector<16x32xf32>
    %41 = arith.subf %40, %26 : vector<16x32xf32>
    %42 = arith.mulf %41, %39 : vector<16x32xf32>
    %43 = arith.mulf %26, %6 : vector<16x32xf32>
    %44 = arith.addf %42, %43 : vector<16x32xf32>
    %c0_23 = arith.constant 0 : index
    %c0_24 = arith.constant 0 : index
    %45 = vector.load %arg9[%c0_23, %c0_24] : memref<32x144xf32, #tpu.memory_space<vmem>>, vector<32x144xf32>
    %cst_25 = arith.constant dense<0.000000e+00> : vector<16x144xf32>
    %46 = tpu.matmul %44, %45, %cst_25 {dimension_numbers = #tpu.dot_dimension_numbers<[1], [0], [0], [1], [0, 0, 1, 1], [], []>} : vector<16x32xf32>, vector<32x144xf32>, vector<16x144xf32> -> vector<16x144xf32>
    %c0_26 = arith.constant 0 : index
    %c0_27 = arith.constant 0 : index
    %47 = vector.load %arg10[%c0_26, %c0_27] : memref<1x144xf32, #tpu.memory_space<vmem>>, vector<1x144xf32>
    %48 = vector.broadcast %47 : vector<1x144xf32> to vector<16x144xf32>
    %49 = arith.addf %46, %48 : vector<16x144xf32>
    %c0_28 = arith.constant 0 : index
    %c0_29 = arith.constant 0 : index
    %50 = vector.load %arg11[%c0_28, %c0_29] : memref<16x144xf32, #tpu.memory_space<vmem>>, vector<16x144xf32>
    tpu.vector_store %arg11[%c0_28, %c0_29], %49 {strides = array<i32>} : memref<16x144xf32, #tpu.memory_space<vmem>>, vector<16x144xf32>,
    return
  }
  func.func @transform_0(%arg0: i32) -> (i32, i32) {
    %c0_i32 = arith.constant 0 : i32
    %c0_i32_0 = arith.constant 0 : i32
    return %arg0, %c0_i32 : i32, i32
  }
  func.func @transform_1(%arg0: i32) -> (i32, i32) {
    %c0_i32 = arith.constant 0 : i32
    %c0_i32_0 = arith.constant 0 : i32
    %c0_i32_1 = arith.constant 0 : i32
    return %c0_i32, %c0_i32_0 : i32, i32
  }
  func.func @transform_2(%arg0: i32) -> (i32, i32) {
    %c0_i32 = arith.constant 0 : i32
    %c0_i32_0 = arith.constant 0 : i32
    %c0_i32_1 = arith.constant 0 : i32
    return %c0_i32, %c0_i32_0 : i32, i32
  }
  func.func @transform_3(%arg0: i32) -> (i32, i32) {
    %c0_i32 = arith.constant 0 : i32
    %c0_i32_0 = arith.constant 0 : i32
    %c0_i32_1 = arith.constant 0 : i32
    return %c0_i32, %c0_i32_0 : i32, i32
  }
  func.func @transform_4(%arg0: i32) -> (i32, i32) {
    %c0_i32 = arith.constant 0 : i32
    %c0_i32_0 = arith.constant 0 : i32
    %c0_i32_1 = arith.constant 0 : i32
    return %c0_i32, %c0_i32_0 : i32, i32
  }
  func.func @transform_5(%arg0: i32) -> (i32, i32) {
    %c0_i32 = arith.constant 0 : i32
    %c0_i32_0 = arith.constant 0 : i32
    %c0_i32_1 = arith.constant 0 : i32
    return %c0_i32, %c0_i32_0 : i32, i32
  }
  func.func @transform_6(%arg0: i32) -> (i32, i32) {
    %c0_i32 = arith.constant 0 : i32
    %c0_i32_0 = arith.constant 0 : i32
    %c0_i32_1 = arith.constant 0 : i32
    return %c0_i32, %c0_i32_0 : i32, i32
  }
  func.func @transform_7(%arg0: i32) -> (i32, i32) {
    %c0_i32 = arith.constant 0 : i32
    %c0_i32_0 = arith.constant 0 : i32
    %c0_i32_1 = arith.constant 0 : i32
    return %c0_i32, %c0_i32_0 : i32, i32
  }
  func.func @transform_8(%arg0: i32) -> (i32, i32) {
    %c0_i32 = arith.constant 0 : i32
    %c0_i32_0 = arith.constant 0 : i32
    %c0_i32_1 = arith.constant 0 : i32
    return %c0_i32, %c0_i32_0 : i32, i32
  }
  func.func @transform_9(%arg0: i32) -> (i32, i32) {
    %c0_i32 = arith.constant 0 : i32
    %c0_i32_0 = arith.constant 0 : i32
    %c0_i32_1 = arith.constant 0 : i32
    return %c0_i32, %c0_i32_0 : i32, i32
  }
  func.func @transform_10(%arg0: i32) -> (i32, i32) {
    %c0_i32 = arith.constant 0 : i32
    %c0_i32_0 = arith.constant 0 : i32
    return %arg0, %c0_i32 : i32, i32
  }
}

</mosaic_0001>

<bundles_post_ra>
// kernel: tpu_custom_call.1
= control target key start
LH: loop header
LB: loop body
LE: loop exit
PB: predicated region body
PF: predicated region fallthrough
CT: control target
= control target key end

     0   :  { %15 = vsyncpa [#allocation3], 0  ;;  %s807_s0 = inlined_call_operand.hbm [shape: f32[16,36], index: 0, kind: input, shape index: {}]   ;;  %s808_s1 = inlined_call_operand.hbm [shape: f32[4,64], index: 1, kind: input, shape index: {}]   ;;  %s809_s2 = inlined_call_operand.hbm [shape: f32[32,64], index: 2, kind: input, shape index: {}]   ;;  %s810_s3 = inlined_call_operand.hbm [shape: f32[4,32], index: 3, kind: input, shape index: {}]   ;;  %s811_s4 = inlined_call_operand.hbm [shape: f32[32,32], index: 4, kind: input, shape index: {}]   ;;  %s812_s5 = inlined_call_operand.vmem [shape: f32[1,64], index: 5, kind: input, shape index: {}]   ;;  %s813_s6 = inlined_call_operand.vmem [shape: f32[1,32], index: 6, kind: input, shape index: {}]   ;;  %s814_s7 = inlined_call_operand.vmem [shape: f32[1,32], index: 7, kind: input, shape index: {}]   ;;  %s815_s8 = inlined_call_operand.hbm [shape: f32[32,144], index: 8, kind: input, shape index: {}]   ;;  %s816_s9 = inlined_call_operand.vmem [shape: f32[1,144], index: 9, kind: input, shape index: {}]   ;;  %s817_s10 = inlined_call_operand.hbm [shape: f32[16,144], index: 10, kind: output, shape index: {}]  }
   0x1   :  { %16 = vsyncpa [#allocation6], 0 }
   0x2   :  { %17 = vsyncpa [#allocation9], 0 }
   0x3   :  { %18 = vsyncpa [#allocation12], 0  ;;  %s38_s15 = sshll.u32 %s808_s1, 4  ;;  %s39_s15 = int_to_ptr.hbm [resolvable:$true] %s38_s15 }
   0x4   :  { %19 = vsyncpa [#allocation4], 0  ;;  %s664_s16 = smov [#allocation5]   ;;  %s62_s20 = sshll.u32 %s810_s3, 4  ;;  %s63_s20 = int_to_ptr.hbm [resolvable:$true] %s62_s20 }
   0x5   :  { %s40_s17 = sshll.u32 %s664_s16, 4  ;;  %s665_s21 = smov [#allocation8]   ;;  %s41_s17 = int_to_ptr.vmem [resolvable:$true] %s40_s17 }
   0x6   :  { %43 = dma.hbm_to_vmem [thread:$0]  %s39_s15, 64, %s41_s17, [#allocation6]  }
   0x7   :  { %s64_s22 = sshll.u32 %s665_s21, 4  ;;  %s24_s25 = sshll.u32 %s807_s0, 4  ;;  %s65_s22 = int_to_ptr.vmem [resolvable:$true] %s64_s22  ;;  %s25_s25 = int_to_ptr.hbm [resolvable:$true] %s24_s25 }
   0x8   :  { %67 = dma.hbm_to_vmem [thread:$0]  %s63_s20, 64, %s65_s22, [#allocation9]  }
   0x9   :  { %s666_s1 = smov [#allocation2]   ;;  %s48_s29 = sshll.u32 %s809_s2, 4  ;;  %s49_s29 = int_to_ptr.hbm [resolvable:$true] %s48_s29 }
   0xa   :  { %s26_s26 = sshll.u32 %s666_s1, 4  ;;  %s667_s30 = smov 128   ;;  %s27_s26 = int_to_ptr.vmem [resolvable:$true] %s26_s26 }
   0xb   :  { %s668_s3 = smov 8   ;;  %s669_s11 = smov [#allocation7]  }
   0xc   :  { %32 = dma.hbm_to_vmem [thread:$0]  %s25_s25, 256, %s27_s26, [#allocation3], %s667_s30, %s667_s30, %s668_s3  }
   0xd   :  { %s50_s12 = sshll.u32 %s669_s11, 4  ;;  %s72_s0 = sshll.u32 %s811_s4, 4  ;;  %s51_s12 = int_to_ptr.vmem [resolvable:$true] %s50_s12  ;;  %s73_s0 = int_to_ptr.hbm [resolvable:$true] %s72_s0 }
   0xe   :  { %56 = dma.hbm_to_vmem [thread:$0]  %s49_s29, 512, %s51_s12, [#allocation6], %s667_s30, %s667_s30, %s668_s3  }
   0xf   :  { %s91_s17 = sshll.u32 %s815_s8, 4  ;;  %s670_s18 = smov [#allocation10]   ;;  %s92_s17 = int_to_ptr.hbm [resolvable:$true] %s91_s17 }
  0x10   :  { %s74_s19 = sshll.u32 %s670_s18, 4  ;;  %s671_s2 = smov [#allocation11]   ;;  %s75_s19 = int_to_ptr.vmem [resolvable:$true] %s74_s19 }
  0x11   :  { %80 = dma.hbm_to_vmem [thread:$0]  %s73_s0, 512, %s75_s19, [#allocation9], %s667_s30, %s667_s30, %s668_s3  }
  0x12   :  { %s93_s20 = sshll.u32 %s671_s2, 4  ;;  %s672_s21 = smov 256   ;;  %s94_s20 = int_to_ptr.vmem [resolvable:$true] %s93_s20 }
  0x13   :  { %s673_s22 = smov 16  }
  0x14   :  { %99 = dma.hbm_to_vmem [thread:$0]  %s92_s17, 1024, %s94_s20, [#allocation12], %s672_s21, %s672_s21, %s673_s22  }
  0x15   :  { %654 = dma.done.wait [#allocation3], 256  }
  0x16   :  { %655 = vsyncadd [#allocation3], 4294967040 }
  0x17   :  { %656 = dma.done.wait [#allocation6], 576  }
  0x18   :  { %657 = vsyncadd [#allocation6], 4294966720 }
  0x19   :  { %658 = dma.done.wait [#allocation9], 576  }
  0x1a   :  { %659 = vsyncadd [#allocation9], 4294966720 }
  0x1b   :  { %660 = dma.done.wait [#allocation12], 1024  }
  0x1c   :  { %661 = vsyncadd [#allocation12], 4294966272  ;;  %vm178_vm0 = vcmask 1043456   ;;  %vm171_vm1 = vcmask 31744   ;;  %v755_v0 = vld [vmem:[#allocation2] sm:$0xff]  ;;  %v757_v1 = vld [vmem:[#allocation2 + $0x8] sm:$0xff] }
  0x1d   :  { %v249_v2 = vld [vmem:[#allocation8] sm:$0xf]  ;;  %v436_v3 = vclamps-f32 %v755_v0, 1.0  ;;  %v136_v4 = vld [vmem:[#allocation7 + $0x18] sm:$0xff]  ;;  %v135_v6 = vld [vmem:[#allocation7 + $0x10] sm:$0xff]  ;;  %s674_s4 = smov 124  }
  0x1e   :  { %455 = vmatpush.msk.msra.mxu3 %vm178_vm0, %v249_v2  ;;  %v283_v5 = vld [vmem:[#allocation10 + $0x18] sm:$0xff]  ;;  %445 = vmatpush.msk.msra.mxu2 %vm178_vm0, %v249_v2  ;;  %v282_v7 = vld [vmem:[#allocation10 + $0x10] sm:$0xff]  ;;  %v134_v8 = vld [vmem:[#allocation7 + $0x8] sm:$0xff]  ;;  %v437_v12 = vclamps-f32 %v757_v1, 1.0  ;;  %vm143_vm2 = vcmask 261120   ;;  %s677_s26 = smov 96  }
  0x1f   :  { %447 = vmatmul.msk.f32.vlgmr.msra.gmra.mxu3 %vm171_vm1, %v757_v1  ;;  %160 = vmatpush.msra.mxu0 %v136_v4  ;;  %v281_v9 = vld [vmem:[#allocation10 + $0x8] sm:$0xff]  ;;  %v133_v10 = vld [vmem:[#allocation7] sm:$0xff]  ;;  %v132_v13 = vld [vmem:[#allocation5] sm:$0xf]  ;;  %vm410_vm11 = vcmask 130048   ;;  %s678_s29 = smov [#allocation13]  }
  0x20   :  { %139 = vrot.lane.b32.xlu0 %v436_v3, %s674_s4  ;;  %300 = vmatpush.msrb.mxu3 %v283_v5  ;;  %v280_v11 = vld [vmem:[#allocation10] sm:$0xff]  ;;  %v473_v18 = vld [vmem:[%s812_s5] ss:$0 sm:$0xff]  ;;  %s418_s30 = sshll.u32 %s678_s29, 4  ;;  %s420_s12 = sshll.u32 %s817_s10, 4  ;;  %s419_s30 = int_to_ptr.vmem [resolvable:$true] %s418_s30  ;;  %s421_s12 = int_to_ptr.hbm [resolvable:$true] %s420_s12 }
  0x21   :  { %161 = vmatpush.msra.mxu0 %v135_v6  ;;  %446 = vmatmul.msk.f32.vlgmr.msra.gmra.mxu2 %vm171_vm1, %v755_v0  ;;  %v471_v40 = vld [vmem:[%s813_s6] ss:$0 sm:$0xff]  ;;  %s675_s6 = smov 32  }
  0x22   :  { %301 = vmatpush.msrb.mxu3 %v282_v7  ;;  %454 = vmatpush.msk.msra.mxu1 %vm178_vm0, %v132_v13  ;;  %v472_v41 = vld [vmem:[%s814_s7] ss:$0 sm:$0xff]  ;;  %s676_s7 = smov 28  }
  0x23   :  { %162 = vmatpush.msra.mxu0 %v134_v8  ;;  %442 = vmatmul.msk.f32.vlgmr.msra.gmra.mxu1 %vm171_vm1, %v757_v1  ;;  %v346_v1 = vld [vmem:[#allocation11 + $0x38] sm:$0xff] }
  0x24   :  { %302 = vmatpush.msrb.mxu3 %v281_v9  ;;  %398 = vmatpush.msrb.mxu2 %v346_v1 }
  0x25   :  { %163 = vmatpush.msra.mxu0 %v133_v10 }
  0x26   :  { %303 = vmatpush.msrb.mxu3 %v280_v11 }
  0x27   :  { %440 = vmatpush.msk.msrb.mxu0 %vm178_vm0, %v132_v13 }
  0x28   :  { %141 = vrot.lane.b32.xlu0 %v437_v12, %s674_s4 }
  0x92   :  { %v140_v14 = vpop.permute.xlu0 %139 }
  0x93   :  { %438 = vmatmul.msk.f32.vlgmr.msra.gmra.mxu0 %vm143_vm2, %v140_v14  ;;  %448 = vmatmul.msk.f32.vlgmr.msrb.gmra.mxu3 %vm143_vm2, %v140_v14 }
  0x9a   :  { %v142_v15 = vpop.permute.xlu0 %141 }
  0x9b   :  { %439 = vmatmul.msk.f32.gmra.mxu0 %vm143_vm2, %v142_v15  ;;  %449 = vmatmul.msk.f32.gmra.mxu3 %vm143_vm2, %v142_v15 }
  0xa0   :  { %v202_v17 = vpop.f32.mrf.mxu1 }
  0xa2   :  { %v277_v23 = vpop.f32.mrf.mxu3 }
  0xa3   :  { %441 = vmatmul.msk.f32.vlgmr.msrb.gmra.mxu0 %vm171_vm1, %v755_v0  ;;  %v278_v49 = vadd.f32 %v471_v40, %v277_v23  ;;  %v343_v0 = vld [vmem:[#allocation11 + $0x20] sm:$0xff] }
  0xa4   :  { %v274_v56 = vpop.f32.mrf.mxu2 }
  0xa5   :  { %v275_v61 = vadd.f32 %v471_v40, %v274_v56 }
 0x110   :  { %v165_v16 = vpop.f32.mrf.mxu0 }
 0x116   :  { %v305_v30 = vpop.f32.mrf.mxu3 }
 0x117   :  { %v306_v59 = vadd.f32 %v472_v41, %v305_v30 }
 0x118   :  { %v168_v19 = vpop.f32.mrf.mxu0 }
 0x119   :  { %v203_v20 = vadd.f32 %v202_v17, %v168_v19  ;;  %v344_v19 = vld [vmem:[#allocation11 + $0x28] sm:$0xff] }
 0x11a   :  { %399 = vmatpush.msrb.mxu2 %v344_v19 }
 0x11b   :  { %v210_v21 = vadd.f32 %v473_v18, %v203_v20  ;;  %v341_v20 = vld [vmem:[#allocation11 + $0x10] sm:$0xff] }
 0x11d   :  { %v444_v22 = vmul.f32 -1.442695, %v210_v21  ;;  %v340_v21 = vld [vmem:[#allocation11 + $0x8] sm:$0xff] }
 0x11e   :  { %v308_v39 = vpop.f32.mrf.mxu3 }
 0x11f   :  { %474 = vpow2.f32 %v444_v22  ;;  %v309_v46 = vadd.f32 %v472_v41, %v308_v39  ;;  %v339_v22 = vld [vmem:[#allocation11] sm:$0xff] }
 0x120   :  { %v199_v24 = vpop.f32.mrf.mxu0 }
 0x121   :  { %v200_v25 = vadd.f32 %v199_v24, %v165_v16 }
 0x123   :  { %v209_v26 = vadd.f32 %v473_v18, %v200_v25  ;;  %v347_v25 = vld [vmem:[%s816_s9] sm:$0x3] }
 0x125   :  { %v475_v27 = vpop.eup %474  ;;  %v443_v28 = vmul.f32 -1.442695, %v209_v26  ;;  %v349_v26 = vperm.slane %v347_v25, 0 }
 0x126   :  { %v218_v29 = vadd.f32 1.0, %v475_v27 }
 0x127   :  { %476 = vpow2.f32 %v443_v28 }
 0x128   :  { %478 = vrcp.f32 %v218_v29  ;;  %v245_v36 = vand.u32 2147483648, %v218_v29  ;;  %v243_v38 = vand.u32 2147483647, %v218_v29  ;;  %vm239_vm4 = vweird.f32 %v218_v29 }
 0x12a   :  { %v246_v44 = vor.u32 1.1754944e-38, %v245_v36  ;;  %vm244_vm6 = vcmp.eq.f32.partialorder %v243_v38, 8.507059e+37 }
 0x12d   :  { %v477_v31 = vpop.eup %476 }
 0x12e   :  { %v479_v32 = vpop.eup %478  ;;  %v217_v33 = vadd.f32 1.0, %v477_v31 }
 0x12f   :  { %v235_v34 = vmul.f32 %v479_v32, %v218_v29  ;;  %vm240_vm3 = vweird.f32 %v479_v32  ;;  %v350_v29 = vperm.slane %v347_v25, 1 }
 0x130   :  { %480 = vrcp.f32 %v217_v33  ;;  %vm241_vm5 = vmor %vm239_vm4, %vm240_vm3  ;;  %v230_v52 = vand.u32 2147483648, %v217_v33  ;;  %v228_v55 = vand.u32 2147483647, %v217_v33  ;;  %vm224_vm8 = vweird.f32 %v217_v33 }
 0x131   :  { %v236_v35 = vsub.f32 1.0, %v235_v34 }
 0x132   :  { %v231_v58 = vor.u32 1.1754944e-38, %v230_v52  ;;  %vm229_vm10 = vcmp.eq.f32.partialorder %v228_v55, 8.507059e+37 }
 0x133   :  { %v237_v37 = vmul.f32 %v479_v32, %v236_v35 }
 0x135   :  { %v238_v42 = vadd.f32 %v479_v32, %v237_v37 }
 0x136   :  { %v481_v43 = vpop.eup %480 }
 0x137   :  { %v242_v45 = vsel %vm241_vm5, %v479_v32, %v238_v42  ;;  %v220_v47 = vmul.f32 %v481_v43, %v217_v33  ;;  %vm225_vm7 = vweird.f32 %v481_v43 }
 0x138   :  { %v247_v48 = vsel %vm244_vm6, %v246_v44, %v242_v45  ;;  %vm226_vm9 = vmor %vm224_vm8, %vm225_vm7 }
 0x139   :  { %v312_v50 = vmul.f32 %v309_v46, %v247_v48  ;;  %v221_v51 = vsub.f32 1.0, %v220_v47  ;;  %v318_v7 = vsub.f32 1.0, %v247_v48 }
 0x13b   :  { %v314_v53 = vadd.f32 %v312_v50, %v278_v49  ;;  %v222_v54 = vmul.f32 %v481_v43, %v221_v51 }
 0x13d   :  { %482 = vtanh.f32 %v314_v53  ;;  %v223_v57 = vadd.f32 %v481_v43, %v222_v54 }
 0x13f   :  { %v227_v60 = vsel %vm226_vm9, %v481_v43, %v223_v57 }
 0x140   :  { %v232_v62 = vsel %vm229_vm10, %v231_v58, %v227_v60 }
 0x141   :  { %v311_v63 = vmul.f32 %v306_v59, %v232_v62  ;;  %v317_v14 = vsub.f32 1.0, %v232_v62 }
 0x143   :  { %v483_v2 = vpop.eup %482  ;;  %v313_v4 = vadd.f32 %v311_v63, %v275_v61 }
 0x144   :  { %323 = vrot.lane.b32.xlu2 %v483_v2, %s675_s6 }
 0x145   :  { %484 = vtanh.f32 %v313_v4 }
 0x14b   :  { %v485_v5 = vpop.eup %484 }
 0x14c   :  { %331 = vrot.lane.b32.xlu2 %v437_v12, %s676_s7  ;;  %321 = vrot.lane.b32.xlu1 %v485_v5, %s675_s6  ;;  %v345_v12 = vld [vmem:[#allocation11 + $0x30] sm:$0xff] }
 0x14d   :  { %375 = vmatpush.msrb.mxu1 %v345_v12 }
 0x14f   :  { %376 = vmatpush.msrb.mxu1 %v343_v0 }
 0x151   :  { %377 = vmatpush.msrb.mxu1 %v341_v20 }
 0x153   :  { %378 = vmatpush.msrb.mxu1 %v339_v22 }
 0x154   :  { %329 = vrot.lane.b32.xlu1 %v436_v3, %s676_s7  ;;  %v342_v3 = vld [vmem:[#allocation11 + $0x18] sm:$0xff] }
 0x155   :  { %400 = vmatpush.msrb.mxu2 %v342_v3 }
 0x157   :  { %401 = vmatpush.msrb.mxu2 %v340_v21 }
 0x19e   :  { %v324_v6 = vpop.permute.xlu2 %323 }
 0x19f   :  { %v328_v9 = vmul.f32 %v324_v6, %v318_v7 }
 0x1a6   :  { %v332_v8 = vpop.permute.xlu2 %331 }
 0x1a7   :  { %v336_v10 = vmul.f32 %v332_v8, %v247_v48 }
 0x1a9   :  { %v338_v11 = vadd.f32 %v336_v10, %v328_v9 }
 0x1ab   :  { %357 = vrot.lane.b32.xlu1 %v338_v11, %s677_s26 }
 0x1be   :  { %v322_v13 = vpop.permute.xlu1 %321 }
 0x1bf   :  { %v327_v16 = vmul.f32 %v322_v13, %v317_v14 }
 0x1c6   :  { %v330_v15 = vpop.permute.xlu1 %329 }
 0x1c7   :  { %v335_v17 = vmul.f32 %v330_v15, %v232_v62 }
 0x1c9   :  { %v337_v18 = vadd.f32 %v335_v17, %v327_v16 }
 0x1cb   :  { %355 = vrot.lane.b32.xlu0 %v337_v18, %s677_s26 }
 0x21d   :  { %v358_v24 = vpop.permute.xlu1 %357 }
 0x23d   :  { %v356_v23 = vpop.permute.xlu0 %355 }
 0x23e   :  { %450 = vmatmul.msk.f32.vlgmr.msrb.gmra.mxu1 %vm143_vm2, %v356_v23  ;;  %452 = vmatmul.msk.f32.vlgmr.msrb.gmra.mxu2 %vm143_vm2, %v356_v23 }
 0x246   :  { %451 = vmatmul.msk.f32.gmra.mxu1 %vm143_vm2, %v358_v24  ;;  %453 = vmatmul.msk.f32.gmra.mxu2 %vm143_vm2, %v358_v24 }
 0x2bb   :  { %v380_v27 = vpop.f32.mrf.mxu1 }
 0x2bc   :  { %v381_v28 = vadd.f32 %v380_v27, %v349_v26 }
 0x2be   :  { %409 = vst [vmem:[#allocation13] sm:$0xff] %v381_v28 }
 0x2c1   :  { %v403_v30 = vpop.f32.mrf.mxu2 }
 0x2c2   :  { %v404_v31 = vadd.f32 %v403_v30, %v350_v29 }
 0x2c3   :  { %v383_v32 = vpop.f32.mrf.mxu1 }
 0x2c4   :  { %411 = vst.msk [vmem:[#allocation13 + $0x8] sm:$0xff] %vm410_vm11, %v404_v31  ;;  %v384_v33 = vadd.f32 %v383_v32, %v349_v26 }
 0x2c6   :  { %412 = vst [vmem:[#allocation13 + $0x10] sm:$0xff] %v384_v33 }
 0x2c9   :  { %v406_v34 = vpop.f32.mrf.mxu2 }
 0x2ca   :  { %v407_v35 = vadd.f32 %v406_v34, %v350_v29 }
 0x2cc   :  { %413 = vst.msk [vmem:[#allocation13 + $0x18] sm:$0xff] %vm410_vm11, %v407_v35 }
 0x2cd   :  { %426 = dma.vmem_to_hbm [thread:$0]  %s419_s30, 512, %s421_s12, [#allocation4], %s672_s21, %s672_s21, %s673_s22  }
 0x2ce   :  { %662 = dma.done.wait [#allocation4], 512  }
 0x2cf   :  { %663 = vsyncadd [#allocation4], 4294966784 }
 0x2d0   :  { %431 = vsyncpa [#allocation3], 1 }
 0x2d1   :  { %432 = vsyncpa [#allocation6], 1 }
 0x2d2   :  { %433 = vsyncpa [#allocation9], 1 }
 0x2d3   :  { %434 = vsyncpa [#allocation12], 1 }
 0x2d4   :  { %435 = vsyncpa [#allocation4], 1 }

</bundles_post_ra>
